<compile_context>
chip_gen: v5e
topology: v5e:2x2
jax: 0.10.0
libtpu: 0.0.40
codegen_flags: <defaults>
</compile_context>

<pallas_src>
import jax
import jax.numpy as jnp
from jax.experimental import pallas as pl
from jax.experimental.pallas import tpu as pltpu


def _round_up(x, m):
    return ((x + m - 1) // m) * m


def _se_mlp_kernel(x_ref, w1_ref, b1_ref, w2_ref, b2_ref, o_ref):
    # x_ref : (C_in,  TILE_R)  -- rows (N*H*W) on the lane axis
    # w1_ref: (C_mid, C_in)    -- resident across the grid (constant index map)
    # b1_ref: (C_mid, 1)
    # w2_ref: (C_out, C_mid)
    # b2_ref: (C_out, 1)
    # o_ref : (C_out, TILE_R)  -- lane-dense output tile
    x = x_ref[...]
    h = jnp.dot(w1_ref[...], x, preferred_element_type=jnp.float32) + b1_ref[...]
    h = jnp.maximum(h, 0.0)  # ReLU
    y = jnp.dot(w2_ref[...], h, preferred_element_type=jnp.float32) + b2_ref[...]
    o_ref[...] = y.astype(o_ref.dtype)


def se_block_forward(x_nchw, w1, b1, w2, b2, *, tile_r=2048):
    """x_nchw: (N, 48, H, W) f32.  w1: (12, 48, 1, 1), b1: (12,),
    w2: (48, 12, 1, 1), b2: (48,).  Returns (N, 48, H, W)."""
    n, c_in, h, w = x_nchw.shape
    c_mid = w1.shape[0]
    c_out = w2.shape[0]
    r = n * h * w
    dtype = x_nchw.dtype
    itemsize = jnp.dtype(dtype).itemsize

    # NCHW -> (C, R) with rows on the lane axis.  For the SE case (H == W == 1,
    # N == 1) this is a pure reshape (no real transpose / extra HBM pass).
    x_cr = jnp.transpose(x_nchw.reshape(n, c_in, h * w), (1, 0, 2)).reshape(c_in, r)

    # Conv weights (out, in, 1, 1) -> left-multiply matmul weights.
    w1_m = w1.reshape(c_mid, c_in).astype(dtype)   # (12, 48)
    w2_m = w2.reshape(c_out, c_mid).astype(dtype)  # (48, 12)
    b1_m = b1.reshape(c_mid, 1).astype(dtype)
    b2_m = b2.reshape(c_out, 1).astype(dtype)

    # Row-tile the lane axis; pad R up to a tile multiple (padded columns are
    # computed but sliced off afterwards).
    tile_r = min(tile_r, _round_up(r, 128))
    r_pad = _round_up(r, tile_r)
    if r_pad != r:
        x_cr = jnp.pad(x_cr, ((0, 0), (0, r_pad - r)))
    grid = (r_pad // tile_r,)

    # Double-buffered input + output tiles + resident weights, with headroom.
    vmem_limit = int(max(4 * tile_r * (c_in + c_out) * itemsize + (1 << 20), 8 << 20))
    cost = pl.CostEstimate(
        flops=2 * r_pad * c_mid * (c_in + c_out),
        transcendentals=0,
        bytes_accessed=r_pad * (c_in + c_out) * itemsize
        + (c_mid * c_in + c_out * c_mid + c_mid + c_out) * itemsize,
    )

    out_cr = pl.pallas_call(
        _se_mlp_kernel,
        out_shape=jax.ShapeDtypeStruct((c_out, r_pad), dtype),
        grid=grid,
        in_specs=[
            pl.BlockSpec((c_in, tile_r), lambda i: (0, i)),   # x tile (pipelined)
            pl.BlockSpec((c_mid, c_in), lambda i: (0, 0)),    # W1 resident
            pl.BlockSpec((c_mid, 1), lambda i: (0, 0)),       # b1 resident
            pl.BlockSpec((c_out, c_mid), lambda i: (0, 0)),   # W2 resident
            pl.BlockSpec((c_out, 1), lambda i: (0, 0)),       # b2 resident
        ],
        out_specs=pl.BlockSpec((c_out, tile_r), lambda i: (0, i)),
        compiler_params=pltpu.CompilerParams(
            dimension_semantics=("parallel",),  # shards rows across v7x's 2 TCs
            vmem_limit_bytes=vmem_limit,
        ),
        cost_estimate=cost,
    )(x_cr, w1_m, b1_m, w2_m, b2_m)

    # (C_out, R_pad) -> drop padding -> NCHW
    out = out_cr[:, :r].reshape(c_out, n, h * w)
    return jnp.transpose(out, (1, 0, 2)).reshape(n, c_out, h, w)


if __name__ == "__main__":
    key = jax.random.PRNGKey(0)
    k_x, k_w1, k_b1, k_w2, k_b2 = jax.random.split(key, 5)

    # Input matching the module's forward: x28 ~ torch.randn([1, 48, 1, 1])
    x = jax.random.normal(k_x, (1, 48, 1, 1), dtype=jnp.float32)

    # Parameters with shapes of Conv2d(48,12,1,1) / Conv2d(12,48,1,1)
    w1 = jax.random.normal(k_w1, (12, 48, 1, 1), dtype=jnp.float32) * 0.1
    b1 = jax.random.normal(k_b1, (12,), dtype=jnp.float32) * 0.1
    w2 = jax.random.normal(k_w2, (48, 12, 1, 1), dtype=jnp.float32) * 0.1
    b2 = jax.random.normal(k_b2, (48,), dtype=jnp.float32) * 0.1

    out = se_block_forward(x, w1, b1, w2, b2)
    jax.block_until_ready(out)

    # Plain-JAX reference (1x1 convs == channel matmuls)
    x_rows = jnp.transpose(x, (0, 2, 3, 1)).reshape(-1, 48)
    h_ref = jnp.maximum(x_rows @ w1.reshape(12, 48).T + b1, 0.0)
    y_ref = h_ref @ w2.reshape(48, 12).T + b2
    ref = jnp.transpose(y_ref.reshape(1, 1, 1, 48), (0, 3, 1, 2))

    assert out.shape == (1, 48, 1, 1)
    assert jnp.allclose(out, ref, atol=1e-5, rtol=1e-5)
    print("KERNEL_OK")
</pallas_src>

<mosaic_0001>
module attributes {stable_mosaic.version = 11 : i64} {
  func.func @_se_mlp_kernel(%arg0: i32, %arg1: memref<48x128xf32, #tpu.memory_space<vmem>>, %arg2: memref<12x48xf32, #tpu.memory_space<vmem>>, %arg3: memref<12x1xf32, #tpu.memory_space<vmem>>, %arg4: memref<48x12xf32, #tpu.memory_space<vmem>>, %arg5: memref<48x1xf32, #tpu.memory_space<vmem>>, %arg6: memref<48x128xf32, #tpu.memory_space<vmem>>) attributes {dimension_semantics = [#tpu.dimension_semantics<parallel>], iteration_bounds = array<i64: 1>, scalar_prefetch = 0 : i64, scratch_operands = 0 : i64, tpu.core_type = #tpu.core_type<tc>, window_params = [{transform_indices = @transform_0, window_bounds = array<i64: 48, 128>}, {pipeline_mode = #tpu.pipeline_mode<synchronous>, transform_indices = @transform_1, window_bounds = array<i64: 12, 48>}, {pipeline_mode = #tpu.pipeline_mode<synchronous>, transform_indices = @transform_2, window_bounds = array<i64: 12, 1>}, {pipeline_mode = #tpu.pipeline_mode<synchronous>, transform_indices = @transform_3, window_bounds = array<i64: 48, 12>}, {pipeline_mode = #tpu.pipeline_mode<synchronous>, transform_indices = @transform_4, window_bounds = array<i64: 48, 1>}, {transform_indices = @transform_5, window_bounds = array<i64: 48, 128>}]} {
    %c0 = arith.constant 0 : index
    %c0_0 = arith.constant 0 : index
    %0 = vector.load %arg1[%c0, %c0_0] : memref<48x128xf32, #tpu.memory_space<vmem>>, vector<48x128xf32>
    %c0_1 = arith.constant 0 : index
    %c0_2 = arith.constant 0 : index
    %1 = vector.load %arg2[%c0_1, %c0_2] : memref<12x48xf32, #tpu.memory_space<vmem>>, vector<12x48xf32>
    %cst = arith.constant dense<0.000000e+00> : vector<12x128xf32>
    %2 = tpu.matmul %1, %0, %cst {dimension_numbers = #tpu.dot_dimension_numbers<[1], [0], [0], [1], [0, 0, 1, 1], [], []>} : vector<12x48xf32>, vector<48x128xf32>, vector<12x128xf32> -> vector<12x128xf32>
    %c0_3 = arith.constant 0 : index
    %c0_4 = arith.constant 0 : index
    %3 = vector.load %arg3[%c0_3, %c0_4] : memref<12x1xf32, #tpu.memory_space<vmem>>, vector<12x1xf32>
    %4 = vector.broadcast %3 : vector<12x1xf32> to vector<12x128xf32>
    %5 = arith.addf %2, %4 : vector<12x128xf32>
    %cst_5 = arith.constant 0.000000e+00 : f32
    %6 = vector.broadcast %cst_5 : f32 to vector<12x128xf32>
    %7 = arith.maximumf %5, %6 : vector<12x128xf32>
    %c0_6 = arith.constant 0 : index
    %c0_7 = arith.constant 0 : index
    %8 = vector.load %arg4[%c0_6, %c0_7] : memref<48x12xf32, #tpu.memory_space<vmem>>, vector<48x12xf32>
    %cst_8 = arith.constant dense<0.000000e+00> : vector<48x128xf32>
    %9 = tpu.matmul %8, %7, %cst_8 {dimension_numbers = #tpu.dot_dimension_numbers<[1], [0], [0], [1], [0, 0, 1, 1], [], []>} : vector<48x12xf32>, vector<12x128xf32>, vector<48x128xf32> -> vector<48x128xf32>
    %c0_9 = arith.constant 0 : index
    %c0_10 = arith.constant 0 : index
    %10 = vector.load %arg5[%c0_9, %c0_10] : memref<48x1xf32, #tpu.memory_space<vmem>>, vector<48x1xf32>
    %11 = vector.broadcast %10 : vector<48x1xf32> to vector<48x128xf32>
    %12 = arith.addf %9, %11 : vector<48x128xf32>
    %c0_11 = arith.constant 0 : index
    %c0_12 = arith.constant 0 : index
    %13 = vector.load %arg6[%c0_11, %c0_12] : memref<48x128xf32, #tpu.memory_space<vmem>>, vector<48x128xf32>
    tpu.vector_store %arg6[%c0_11, %c0_12], %12 {strides = array<i32>} : memref<48x128xf32, #tpu.memory_space<vmem>>, vector<48x128xf32>,
    return
  }
  func.func @transform_0(%arg0: i32) -> (i32, i32) {
    %c0_i32 = arith.constant 0 : i32
    %c0_i32_0 = arith.constant 0 : i32
    return %c0_i32, %arg0 : i32, i32
  }
  func.func @transform_1(%arg0: i32) -> (i32, i32) {
    %c0_i32 = arith.constant 0 : i32
    %c0_i32_0 = arith.constant 0 : i32
    %c0_i32_1 = arith.constant 0 : i32
    return %c0_i32, %c0_i32_0 : i32, i32
  }
  func.func @transform_2(%arg0: i32) -> (i32, i32) {
    %c0_i32 = arith.constant 0 : i32
    %c0_i32_0 = arith.constant 0 : i32
    %c0_i32_1 = arith.constant 0 : i32
    return %c0_i32, %c0_i32_0 : i32, i32
  }
  func.func @transform_3(%arg0: i32) -> (i32, i32) {
    %c0_i32 = arith.constant 0 : i32
    %c0_i32_0 = arith.constant 0 : i32
    %c0_i32_1 = arith.constant 0 : i32
    return %c0_i32, %c0_i32_0 : i32, i32
  }
  func.func @transform_4(%arg0: i32) -> (i32, i32) {
    %c0_i32 = arith.constant 0 : i32
    %c0_i32_0 = arith.constant 0 : i32
    %c0_i32_1 = arith.constant 0 : i32
    return %c0_i32, %c0_i32_0 : i32, i32
  }
  func.func @transform_5(%arg0: i32) -> (i32, i32) {
    %c0_i32 = arith.constant 0 : i32
    %c0_i32_0 = arith.constant 0 : i32
    return %c0_i32, %arg0 : i32, i32
  }
}

</mosaic_0001>

<bundles_post_ra>
// kernel: tpu_custom_call.1
= control target key start
LH: loop header
LB: loop body
LE: loop exit
PB: predicated region body
PF: predicated region fallthrough
CT: control target
= control target key end

     0   :  { %v247_v4 = vmov 0   ;;  %s350_s0 = inlined_call_operand.vmem [shape: f32[48,128], index: 0, kind: input, shape index: {}]   ;;  %s351_s1 = inlined_call_operand.vmem [shape: f32[12,48], index: 1, kind: input, shape index: {}]   ;;  %s352_s2 = inlined_call_operand.vmem [shape: f32[12,1], index: 2, kind: input, shape index: {}]   ;;  %s353_s3 = inlined_call_operand.vmem [shape: f32[48,12], index: 3, kind: input, shape index: {}]   ;;  %s354_s4 = inlined_call_operand.vmem [shape: f32[48,1], index: 4, kind: input, shape index: {}]   ;;  %s355_s5 = inlined_call_operand.hbm [shape: f32[48,128], index: 5, kind: output, shape index: {}]  }
   0x1   :  { %v26_v0 = vld [vmem:[%s350_s0 + $0x28] sm:$0xff]  ;;  %v25_v1 = vld [vmem:[%s350_s0 + $0x20] sm:$0xff]  ;;  %v24_v3 = vld [vmem:[%s350_s0 + $0x18] sm:$0xff]  ;;  %218 = vset.pattern.permute.xlu0 %v247_v4  ;;  %219 = vset.pattern.permute.xlu1 %v247_v4 }
   0x2   :  { %58 = vmatpush.msra.mxu0 %v26_v0  ;;  %206 = vmatpush.msra.mxu3 %v26_v0  ;;  %v30_v2 = vld [vmem:[%s352_s2 + $0x8] sm:$0xf] }
   0x4   :  { %59 = vmatpush.msra.mxu0 %v25_v1  ;;  %207 = vmatpush.msra.mxu3 %v25_v1 }
   0x5   :  { %10 = vsyncpa [#allocation3], 0  ;;  %38 = vperm.xlu0 %218, %v30_v2   ;;  %v23_v5 = vld [vmem:[%s350_s0 + $0x10] sm:$0xff]  ;;  %220 = vset.pattern.permute.xlu2 %v247_v4  ;;  %v22_v6 = vld [vmem:[%s350_s0 + $0x8] sm:$0xff]  ;;  %vm41_vm0 = vcmask 392192   ;;  %vm134_vm1 = vcmask 1043456  }
   0x6   :  { %60 = vmatpush.msra.mxu0 %v24_v3  ;;  %208 = vmatpush.msra.mxu3 %v24_v3  ;;  %v21_v7 = vld [vmem:[%s350_s0] sm:$0xff]  ;;  %v28_v9 = vld [vmem:[%s351_s1 + $0x8] sm:$0xf]  ;;  %v81_v16 = vld [vmem:[%s354_s4 + $0x10] sm:$0xff]  ;;  %vm115_vm2 = vcmask 97280   ;;  %s185_s11 = sshll.u32 %s355_s5, 4  ;;  %s186_s11 = int_to_ptr.hbm [resolvable:$true] %s185_s11 }
   0x7   :  { %v27_v8 = vld [vmem:[%s351_s1] sm:$0xff]  ;;  %v80_v13 = vld [vmem:[%s354_s4 + $0x8] sm:$0xff]  ;;  %97 = vperm.xlu2 %220, %v81_v16   ;;  %v82_v18 = vld [vmem:[%s354_s4 + $0x18] sm:$0xff]  ;;  %s249_s12 = smov 128   ;;  %s250_s0 = smov 8  }
   0x8   :  { %61 = vmatpush.msra.mxu0 %v23_v5  ;;  %209 = vmatpush.msra.mxu3 %v23_v5  ;;  %v29_v10 = vld [vmem:[%s352_s2] sm:$0xff]  ;;  %v84_v15 = vld [vmem:[%s354_s4 + $0x28] sm:$0xff]  ;;  %v76_v26 = vld [vmem:[%s353_s3 + $0x18] sm:$0xff] }
   0x9   :  { %v83_v11 = vld [vmem:[%s354_s4 + $0x20] sm:$0xff]  ;;  %v74_v27 = vld [vmem:[%s353_s3 + $0x8] sm:$0xff]  ;;  %v75_v29 = vld [vmem:[%s353_s3 + $0x10] sm:$0xff] }
   0xa   :  { %62 = vmatpush.msra.mxu0 %v22_v6  ;;  %210 = vmatpush.msra.mxu3 %v22_v6  ;;  %v79_v12 = vld [vmem:[%s354_s4] sm:$0xff]  ;;  %v78_v30 = vld [vmem:[%s353_s3 + $0x28] sm:$0xff] }
   0xb   :  { %87 = vperm.xlu1 %219, %v79_v12   ;;  %v73_v25 = vld [vmem:[%s353_s3] sm:$0xff] }
   0xc   :  { %63 = vmatpush.msra.mxu0 %v21_v7  ;;  %211 = vmatpush.msra.mxu3 %v21_v7  ;;  %v77_v28 = vld [vmem:[%s353_s3 + $0x20] sm:$0xff]  ;;  %s248_s3 = smov [#allocation2]  }
   0xd   :  { %197 = vmatmul.msk.f32.vlgmr.msra.gmra.mxu0 %vm41_vm0, %v27_v8  ;;  %198 = vmatmul.msk.f32.vlgmr.msra.gmra.mxu3 %vm41_vm0, %v28_v9  ;;  %s183_s8 = sshll.u32 %s248_s3, 4  ;;  %s184_s8 = int_to_ptr.vmem [resolvable:$true] %s183_s8 }
   0xe   :  { %33 = vperm.xlu0 %218, %v29_v10  }
   0xf   :  { %102 = vperm.xlu2 %220, %v82_v18  }
  0x13   :  { %92 = vperm.xlu1 %219, %v80_v13  }
  0x16   :  { %107 = vperm.xlu0 %218, %v83_v11  }
  0x1b   :  { %112 = vperm.xlu1 %219, %v84_v15  }
  0x61   :  { %v98_v31 = vpop.permute.xlu2 %97 }
  0x69   :  { %v103_v35 = vpop.permute.xlu2 %102 }
  0x77   :  { %v39_v14 = vpop.permute.xlu0 %38 }
  0x7d   :  { %v88_v32 = vpop.permute.xlu1 %87 }
  0x80   :  { %v34_v19 = vpop.permute.xlu0 %33 }
  0x85   :  { %v93_v38 = vpop.permute.xlu1 %92 }
  0x88   :  { %v108_v41 = vpop.permute.xlu0 %107 }
  0x8a   :  { %v65_v17 = vpop.f32.mrf.mxu0 }
  0x8b   :  { %v66_v21 = vadd.f32 %v65_v17, %v34_v19 }
  0x8d   :  { %v71_v24 = vmax.f32 %v66_v21, 0.0  ;;  %v113_v46 = vpop.permute.xlu1 %112 }
  0x90   :  { %v68_v20 = vpop.f32.mrf.mxu3 }
  0x91   :  { %v69_v22 = vadd.f32 %v68_v20, %v39_v14 }
  0x93   :  { %v72_v23 = vmax.f32 %v69_v22, 0.0 }
  0x95   :  { %199 = vmatpush.msk.msra.mxu1 %vm134_vm1, %v72_v23  ;;  %212 = vmatpush.msk.msra.mxu2 %vm134_vm1, %v72_v23 }
  0x97   :  { %153 = vmatpush.msra.mxu1 %v71_v24  ;;  %213 = vmatpush.msra.mxu2 %v71_v24 }
  0x98   :  { %200 = vmatmul.msk.f32.vlgmr.msra.gmra.mxu1 %vm115_vm2, %v73_v25  ;;  %203 = vmatmul.msk.f32.vlgmr.msra.gmra.mxu2 %vm115_vm2, %v76_v26 }
  0xa0   :  { %201 = vmatmul.msk.f32.gmra.mxu1 %vm115_vm2, %v74_v27  ;;  %204 = vmatmul.msk.f32.gmra.mxu2 %vm115_vm2, %v77_v28 }
  0xa8   :  { %202 = vmatmul.msk.f32.gmra.mxu1 %vm115_vm2, %v75_v29  ;;  %205 = vmatmul.msk.f32.gmra.mxu2 %vm115_vm2, %v78_v30 }
 0x115   :  { %v155_v33 = vpop.f32.mrf.mxu1 }
 0x116   :  { %v156_v34 = vadd.f32 %v155_v33, %v88_v32 }
 0x118   :  { %173 = vst [vmem:[#allocation2] sm:$0xff] %v156_v34 }
 0x11b   :  { %v164_v36 = vpop.f32.mrf.mxu2 }
 0x11c   :  { %v165_v37 = vadd.f32 %v164_v36, %v103_v35 }
 0x11d   :  { %v158_v39 = vpop.f32.mrf.mxu1 }
 0x11e   :  { %176 = vst [vmem:[#allocation2 + $0x18] sm:$0xff] %v165_v37  ;;  %v159_v40 = vadd.f32 %v158_v39, %v93_v38 }
 0x120   :  { %174 = vst [vmem:[#allocation2 + $0x8] sm:$0xff] %v159_v40 }
 0x123   :  { %v167_v42 = vpop.f32.mrf.mxu2 }
 0x124   :  { %v168_v43 = vadd.f32 %v167_v42, %v108_v41 }
 0x125   :  { %v161_v44 = vpop.f32.mrf.mxu1 }
 0x126   :  { %177 = vst [vmem:[#allocation2 + $0x20] sm:$0xff] %v168_v43  ;;  %v162_v45 = vadd.f32 %v161_v44, %v98_v31 }
 0x128   :  { %175 = vst [vmem:[#allocation2 + $0x10] sm:$0xff] %v162_v45 }
 0x12b   :  { %v170_v47 = vpop.f32.mrf.mxu2 }
 0x12c   :  { %v171_v48 = vadd.f32 %v170_v47, %v113_v46 }
 0x12e   :  { %178 = vst [vmem:[#allocation2 + $0x28] sm:$0xff] %v171_v48 }
 0x12f   :  { %191 = dma.vmem_to_hbm [thread:$0]  %s184_s8, 768, %s186_s11, [#allocation3], %s249_s12, %s249_s12, %s250_s0  }
 0x130   :  { %245 = dma.done.wait [#allocation3], 768  }
 0x131   :  { %246 = vsyncadd [#allocation3], 4294966528 }
 0x132   :  { %196 = vsyncpa [#allocation3], 1 }

</bundles_post_ra>
